<compile_context>
chip_gen: v5e
topology: v5e:2x2
jax: 0.10.0
libtpu: 0.0.40
codegen_flags: <defaults>
</compile_context>

<pallas_src>
import jax
import jax.numpy as jnp
from jax.experimental import pallas as pl
from jax.experimental.pallas import tpu as pltpu

OBS_DIM = 32              # stands in for config.OBS_DIM_RESULT_MODEL
HIDDEN = 64
NUM_CLASSES = 3
PAD_C = 128               # W2/b2 columns zero-padded to one full lane tile
TILE_B = 8192             # default batch tile (rows per grid step)
FAST_PATH_ROWS = 1024     # below this, fused jnp beats any custom call
VMEM_BUDGET = 40 * 1024 * 1024   # headroom inside v7x's 64 MiB physical VMEM


def mlp_kernel(x_ref, w1_ref, b1_ref, w2_ref, b2_ref, o_ref):
    # Layer 1: cast the streamed f32 x tile to bf16 in VMEM (free under DMA slack)
    # so the MXU runs bf16 x bf16 -> f32; bias + ReLU stay f32 on the VPU.
    xb = x_ref[...].astype(jnp.bfloat16)
    h = jnp.dot(xb, w1_ref[...], preferred_element_type=jnp.float32)
    h = jnp.maximum(h + b1_ref[...], 0.0)
    # Layer 2: h stays f32 (never re-packed to bf16); W2 is tiny, f32, 128-lane padded.
    out = jnp.dot(h, w2_ref[...], preferred_element_type=jnp.float32) + b2_ref[...]
    # Store only the real classes; padded W2/b2 columns are zeros.
    o_ref[...] = out[:, :NUM_CLASSES].astype(o_ref.dtype)


def _round_up(a, m):
    return (a + m - 1) // m * m


def _tile_vmem_bytes(tb):
    # x double buffer + lane-padded (128-lane) out double buffer + intermediates + weights.
    return (2 * tb * OBS_DIM * 4          # x blocks (f32)
            + 2 * tb * 128 * 4            # out blocks, lane-padded from 3 -> 128 lanes
            + tb * HIDDEN * 4             # h
            + tb * PAD_C * 4              # layer-2 result before the class slice
            + OBS_DIM * HIDDEN * 2 + HIDDEN * 4
            + HIDDEN * PAD_C * 4 + PAD_C * 4)


def result_model_forward(x, w1, b1, w2, b2, *, tile_b=TILE_B, force_kernel=False):
    """x: (B, OBS_DIM) f32; returns logits (B, NUM_CLASSES) f32.

    Equivalent to nn.Linear(obs_dim, 64) -> ReLU -> nn.Linear(64, 3) with weights
    stored transposed as (in_features, out_features).
    """
    B = x.shape[0]

    # Small-batch fast path (e.g. predict()'s B=1/2): XLA-fused jnp is strictly
    # faster than custom-call launch + grid overhead at these sizes.
    if not force_kernel and B < FAST_PATH_ROWS:
        xq = x.astype(jnp.bfloat16)
        w1q = w1.astype(jnp.bfloat16)
        h = jnp.maximum(jnp.dot(xq, w1q, preferred_element_type=jnp.float32) + b1, 0.0)
        return jnp.dot(h, w2, preferred_element_type=jnp.float32) + b2

    # Batch tile: multiple of 16 rows (bf16 sublane packing), as large as fits.
    tb = min(int(tile_b), _round_up(B, 16))
    # Prefer >= 2 grid steps on large batches so v7x can shard over both TCs.
    if B >= 4096 and pl.cdiv(B, tb) < 2:
        tb = _round_up(pl.cdiv(B, 2), 16)
    # Re-derive the tile against the VMEM budget (lane-padded out blocks dominate).
    while tb > 16 and _tile_vmem_bytes(tb) > VMEM_BUDGET:
        tb = _round_up(tb // 2, 16)

    # Ragged final block handled by the grid: OOB reads feed dropped rows only,
    # OOB writes are discarded. No jnp.pad pass over the batch.
    grid = (pl.cdiv(B, tb),)

    # Weight prep (tiny, one-off XLA ops, all VMEM-resident inside the kernel).
    w1_bf = w1.astype(jnp.bfloat16)
    b1_f = b1.astype(jnp.float32)
    w2_p = jnp.zeros((HIDDEN, PAD_C), jnp.float32).at[:, :NUM_CLASSES].set(w2)
    b2_p = jnp.zeros((1, PAD_C), jnp.float32).at[:, :NUM_CLASSES].set(b2)

    cost = pl.CostEstimate(
        flops=2 * B * (OBS_DIM * HIDDEN + HIDDEN * NUM_CLASSES),
        transcendentals=0,
        bytes_accessed=(B * OBS_DIM * 4            # x (f32, streamed once)
                        + B * NUM_CLASSES * 4      # logits (f32)
                        + OBS_DIM * HIDDEN * 2 + HIDDEN * 4
                        + HIDDEN * PAD_C * 4 + PAD_C * 4),
    )

    vmem_limit = min(48 * 1024 * 1024,
                     max(32 * 1024 * 1024, int(1.5 * _tile_vmem_bytes(tb))))

    return pl.pallas_call(
        mlp_kernel,
        out_shape=jax.ShapeDtypeStruct((B, NUM_CLASSES), jnp.float32),
        grid_spec=pltpu.PrefetchScalarGridSpec(
            num_scalar_prefetch=0,
            grid=grid,
            in_specs=[
                pl.BlockSpec((tb, OBS_DIM), lambda i: (i, 0)),        # x tile (pipelined)
                pl.BlockSpec((OBS_DIM, HIDDEN), lambda i: (0, 0)),    # W1, VMEM-resident
                pl.BlockSpec((1, HIDDEN), lambda i: (0, 0)),          # b1, VMEM-resident
                pl.BlockSpec((HIDDEN, PAD_C), lambda i: (0, 0)),      # W2 (lane-padded)
                pl.BlockSpec((1, PAD_C), lambda i: (0, 0)),           # b2 (lane-padded)
            ],
            out_specs=pl.BlockSpec((tb, NUM_CLASSES), lambda i: (i, 0)),
        ),
        compiler_params=pltpu.CompilerParams(
            dimension_semantics=("parallel",),      # shard batch steps over both TCs (v7x)
            vmem_limit_bytes=vmem_limit,
        ),
        cost_estimate=cost,
    )(x, w1_bf, b1_f, w2_p, b2_p)


def init_params(key):
    """Deterministic init mimicking PyTorch's default Linear init (uniform +-1/sqrt(fan_in))."""
    k1, k2, k3, k4 = jax.random.split(key, 4)
    lim1 = 1.0 / jnp.sqrt(OBS_DIM)
    lim2 = 1.0 / jnp.sqrt(HIDDEN)
    # stored as (in_features, out_features) — transposed relative to torch's (out, in)
    w1 = jax.random.uniform(k1, (OBS_DIM, HIDDEN), jnp.float32, -lim1, lim1)
    b1 = jax.random.uniform(k2, (1, HIDDEN), jnp.float32, -lim1, lim1)
    w2 = jax.random.uniform(k3, (HIDDEN, NUM_CLASSES), jnp.float32, -lim2, lim2)
    b2 = jax.random.uniform(k4, (1, NUM_CLASSES), jnp.float32, -lim2, lim2)
    return w1, b1, w2, b2


def _reference(x, w1, b1, w2, b2):
    # Reference using the same bf16-quantized x/W1 the kernel's first dot sees
    # (products are exact in f32, so kernel vs. reference differ only by sum order).
    xq = x.astype(jnp.bfloat16).astype(jnp.float32)
    w1q = w1.astype(jnp.bfloat16).astype(jnp.float32)
    return jnp.maximum(xq @ w1q + b1, 0.0) @ w2 + b2


if __name__ == "__main__":
    key = jax.random.PRNGKey(0)
    kx, kp, kx2 = jax.random.split(key, 3)
    w1, b1, w2, b2 = init_params(kp)

    # predict()-style tiny batch; force the Pallas path so the kernel itself runs.
    batch = 2
    x = jax.random.normal(kx, (batch, OBS_DIM), jnp.float32)
    logits = result_model_forward(x, w1, b1, w2, b2, force_kernel=True)
    jax.block_until_ready(logits)
    assert logits.shape == (batch, NUM_CLASSES)
    ref = _reference(x, w1, b1, w2, b2)
    assert jnp.allclose(logits, ref, atol=2e-3, rtol=2e-3)

    # Default small-batch fast path (no pallas_call) must agree as well.
    logits_fp = result_model_forward(x, w1, b1, w2, b2)
    jax.block_until_ready(logits_fp)
    assert jnp.allclose(logits_fp, ref, atol=2e-3, rtol=2e-3)

    # Multi-step grid + ragged final block (no jnp.pad anywhere in the wrapper).
    batch2 = 300
    x2 = jax.random.normal(kx2, (batch2, OBS_DIM), jnp.float32)
    logits2 = result_model_forward(x2, w1, b1, w2, b2, tile_b=128, force_kernel=True)
    jax.block_until_ready(logits2)
    assert logits2.shape == (batch2, NUM_CLASSES)
    ref2 = _reference(x2, w1, b1, w2, b2)
    assert jnp.allclose(logits2, ref2, atol=2e-3, rtol=2e-3)

    # TODO(synk): predict()'s softmax + Categorical sampling and the Chinese string
    # labels ('success' / 'out' / 'net') are host-side glue, not kernel work.
    print("KERNEL_OK")
</pallas_src>

<mosaic_0001>
module attributes {stable_mosaic.version = 11 : i64} {
  func.func @mlp_kernel(%arg0: i32, %arg1: memref<16x32xf32, #tpu.memory_space<vmem>>, %arg2: memref<32x64xbf16, #tpu.memory_space<vmem>>, %arg3: memref<1x64xf32, #tpu.memory_space<vmem>>, %arg4: memref<64x128xf32, #tpu.memory_space<vmem>>, %arg5: memref<1x128xf32, #tpu.memory_space<vmem>>, %arg6: memref<16x3xf32, #tpu.memory_space<vmem>>) attributes {dimension_semantics = [#tpu.dimension_semantics<parallel>], iteration_bounds = array<i64: 1>, scalar_prefetch = 0 : i64, scratch_operands = 0 : i64, tpu.core_type = #tpu.core_type<tc>, window_params = [{transform_indices = @transform_0, window_bounds = array<i64: 16, 32>}, {pipeline_mode = #tpu.pipeline_mode<synchronous>, transform_indices = @transform_1, window_bounds = array<i64: 32, 64>}, {pipeline_mode = #tpu.pipeline_mode<synchronous>, transform_indices = @transform_2, window_bounds = array<i64: 1, 64>}, {pipeline_mode = #tpu.pipeline_mode<synchronous>, transform_indices = @transform_3, window_bounds = array<i64: 64, 128>}, {pipeline_mode = #tpu.pipeline_mode<synchronous>, transform_indices = @transform_4, window_bounds = array<i64: 1, 128>}, {transform_indices = @transform_5, window_bounds = array<i64: 16, 3>}]} {
    %c0 = arith.constant 0 : index
    %c0_0 = arith.constant 0 : index
    %0 = vector.load %arg1[%c0, %c0_0] : memref<16x32xf32, #tpu.memory_space<vmem>>, vector<16x32xf32>
    %1 = arith.truncf %0 : vector<16x32xf32> to vector<16x32xbf16>
    %c0_1 = arith.constant 0 : index
    %c0_2 = arith.constant 0 : index
    %2 = vector.load %arg2[%c0_1, %c0_2] : memref<32x64xbf16, #tpu.memory_space<vmem>>, vector<32x64xbf16>
    %cst = arith.constant dense<0.000000e+00> : vector<16x64xf32>
    %3 = tpu.matmul %1, %2, %cst {dimension_numbers = #tpu.dot_dimension_numbers<[1], [0], [0], [1], [0, 0, 1, 1], [], []>} : vector<16x32xbf16>, vector<32x64xbf16>, vector<16x64xf32> -> vector<16x64xf32>
    %c0_3 = arith.constant 0 : index
    %c0_4 = arith.constant 0 : index
    %4 = vector.load %arg3[%c0_3, %c0_4] : memref<1x64xf32, #tpu.memory_space<vmem>>, vector<1x64xf32>
    %5 = vector.broadcast %4 : vector<1x64xf32> to vector<16x64xf32>
    %6 = arith.addf %3, %5 : vector<16x64xf32>
    %cst_5 = arith.constant 0.000000e+00 : f32
    %7 = vector.broadcast %cst_5 : f32 to vector<16x64xf32>
    %8 = arith.maximumf %6, %7 : vector<16x64xf32>
    %c0_6 = arith.constant 0 : index
    %c0_7 = arith.constant 0 : index
    %9 = vector.load %arg4[%c0_6, %c0_7] : memref<64x128xf32, #tpu.memory_space<vmem>>, vector<64x128xf32>
    %cst_8 = arith.constant dense<0.000000e+00> : vector<16x128xf32>
    %10 = tpu.matmul %8, %9, %cst_8 {dimension_numbers = #tpu.dot_dimension_numbers<[1], [0], [0], [1], [0, 0, 1, 1], [], []>} : vector<16x64xf32>, vector<64x128xf32>, vector<16x128xf32> -> vector<16x128xf32>
    %c0_9 = arith.constant 0 : index
    %c0_10 = arith.constant 0 : index
    %11 = vector.load %arg5[%c0_9, %c0_10] : memref<1x128xf32, #tpu.memory_space<vmem>>, vector<1x128xf32>
    %12 = vector.broadcast %11 : vector<1x128xf32> to vector<16x128xf32>
    %13 = arith.addf %10, %12 : vector<16x128xf32>
    %14 = vector.extract_strided_slice %13 {offsets = [0, 0], sizes = [16, 3], strides = [1, 1]} : vector<16x128xf32> to vector<16x3xf32>
    %c0_11 = arith.constant 0 : index
    %c0_12 = arith.constant 0 : index
    %15 = vector.load %arg6[%c0_11, %c0_12] : memref<16x3xf32, #tpu.memory_space<vmem>>, vector<16x3xf32>
    tpu.vector_store %arg6[%c0_11, %c0_12], %14 {strides = array<i32>} : memref<16x3xf32, #tpu.memory_space<vmem>>, vector<16x3xf32>,
    return
  }
  func.func @transform_0(%arg0: i32) -> (i32, i32) {
    %c0_i32 = arith.constant 0 : i32
    %c0_i32_0 = arith.constant 0 : i32
    return %arg0, %c0_i32 : i32, i32
  }
  func.func @transform_1(%arg0: i32) -> (i32, i32) {
    %c0_i32 = arith.constant 0 : i32
    %c0_i32_0 = arith.constant 0 : i32
    %c0_i32_1 = arith.constant 0 : i32
    return %c0_i32, %c0_i32_0 : i32, i32
  }
  func.func @transform_2(%arg0: i32) -> (i32, i32) {
    %c0_i32 = arith.constant 0 : i32
    %c0_i32_0 = arith.constant 0 : i32
    %c0_i32_1 = arith.constant 0 : i32
    return %c0_i32, %c0_i32_0 : i32, i32
  }
  func.func @transform_3(%arg0: i32) -> (i32, i32) {
    %c0_i32 = arith.constant 0 : i32
    %c0_i32_0 = arith.constant 0 : i32
    %c0_i32_1 = arith.constant 0 : i32
    return %c0_i32, %c0_i32_0 : i32, i32
  }
  func.func @transform_4(%arg0: i32) -> (i32, i32) {
    %c0_i32 = arith.constant 0 : i32
    %c0_i32_0 = arith.constant 0 : i32
    %c0_i32_1 = arith.constant 0 : i32
    return %c0_i32, %c0_i32_0 : i32, i32
  }
  func.func @transform_5(%arg0: i32) -> (i32, i32) {
    %c0_i32 = arith.constant 0 : i32
    %c0_i32_0 = arith.constant 0 : i32
    return %arg0, %c0_i32 : i32, i32
  }
}

</mosaic_0001>

<bundles_post_ra>
// kernel: tpu_custom_call.1
= control target key start
LH: loop header
LB: loop body
LE: loop exit
PB: predicated region body
PF: predicated region fallthrough
CT: control target
= control target key end

     0   :  { %10 = vsyncpa [#allocation3], 0  ;;  %s376_s0 = inlined_call_operand.hbm [shape: f32[2,32], index: 0, kind: input, shape index: {}]   ;;  %s377_s1 = inlined_call_operand.hbm [shape: bf16[32,64], index: 1, kind: input, shape index: {}]   ;;  %s378_s2 = inlined_call_operand.vmem [shape: f32[1,64], index: 2, kind: input, shape index: {}]   ;;  %s379_s3 = inlined_call_operand.hbm [shape: f32[64,128], index: 3, kind: input, shape index: {}]   ;;  %s380_s4 = inlined_call_operand.vmem [shape: f32[1,128], index: 4, kind: input, shape index: {}]   ;;  %s381_s5 = inlined_call_operand.hbm [shape: f32[2,3], index: 5, kind: output, shape index: {}]  }
   0x1   :  { %11 = vsyncpa [#allocation6], 0 }
   0x2   :  { %12 = vsyncpa [#allocation4], 0  ;;  %s30_s20 = sshll.u32 %s377_s1, 4  ;;  %s31_s20 = int_to_ptr.hbm [resolvable:$true] %s30_s20 }
   0x3   :  { %16 = vsyncadd [#allocation3], 224  ;;  %s312_s21 = smov [#allocation5]   ;;  %s17_s25 = sshll.u32 %s376_s0, 4  ;;  %s18_s25 = int_to_ptr.hbm [resolvable:$true] %s17_s25 }
   0x4   :  { %s32_s22 = sshll.u32 %s312_s21, 4  ;;  %s313_s26 = smov 64   ;;  %s33_s22 = int_to_ptr.vmem [resolvable:$true] %s32_s22 }
   0x5   :  { %s314_s27 = smov 4   ;;  %s315_s28 = smov [#allocation2]  }
   0x6   :  { %38 = dma.hbm_to_vmem [thread:$0]  %s31_s20, 256, %s33_s22, [#allocation6], %s313_s26, %s313_s26, %s314_s27  }
   0x7   :  { %s19_s29 = sshll.u32 %s315_s28, 4  ;;  %s316_s30 = smov 32   ;;  %s20_s29 = int_to_ptr.vmem [resolvable:$true] %s19_s29 }
   0x8   :  { %s317_s6 = smov 2   ;;  %s45_s8 = sshll.u32 %s379_s3, 4  ;;  %s46_s8 = int_to_ptr.hbm [resolvable:$true] %s45_s8 }
   0x9   :  { %25 = dma.hbm_to_vmem [thread:$0]  %s18_s25, 32, %s20_s29, [#allocation3], %s316_s30, %s316_s30, %s317_s6  }
   0xa   :  { %s318_s9 = smov [#allocation7]   ;;  %s319_s10 = smov 128  }
   0xb   :  { %s47_s0 = sshll.u32 %s318_s9, 4  ;;  %s320_s11 = smov 8   ;;  %s48_s0 = int_to_ptr.vmem [resolvable:$true] %s47_s0 }
   0xc   :  { %53 = dma.hbm_to_vmem [thread:$0]  %s46_s8, 1024, %s48_s0, [#allocation6], %s319_s10, %s319_s10, %s320_s11  }
   0xd   :  { %306 = dma.done.wait [#allocation3], 256  }
   0xe   :  { %307 = vsyncadd [#allocation3], 4294967040 }
   0xf   :  { %308 = dma.done.wait [#allocation6], 1280  }
  0x10   :  { %309 = vsyncadd [#allocation6], 4294966016  ;;  %v189_v0 = vld [vmem:[#allocation5 + $0x8] sm:$0xff]  ;;  %v118_v2 = vld [vmem:[#allocation7 + $0x30] sm:$0xff]  ;;  %vm92_vm0 = vcmask 261120   ;;  %vm124_vm1 = vcmask 523264  }
  0x11   :  { %v119_v1 = vld [vmem:[#allocation7 + $0x38] sm:$0xff]  ;;  %102 = vmatpush.bf16.msra.mxu0 %v189_v0  ;;  %v188_v3 = vld [vmem:[#allocation5] sm:$0xff]  ;;  %v69_v4 = vld [vmem:[#allocation2] sm:$0xff]  ;;  %vm154_vm2 = vcmask 23552  }
  0x12   :  { %v70_v5 = vld [vmem:[#allocation2 + $0x8] sm:$0xff]  ;;  %139 = vmatpush.msra.mxu1 %v119_v1  ;;  %190 = vmatpush.msra.mxu2 %v119_v1  ;;  %v116_v8 = vld [vmem:[#allocation7 + $0x20] sm:$0xff]  ;;  %v115_v9 = vld [vmem:[#allocation7 + $0x18] sm:$0xff] }
  0x13   :  { %v117_v6 = vld [vmem:[#allocation7 + $0x28] sm:$0xff]  ;;  %v71_v7 = vpack.c.bf16 %v70_v5, %v69_v4  ;;  %v114_v10 = vld [vmem:[#allocation7 + $0x10] sm:$0xff]  ;;  %v112_v12 = vld [vmem:[#allocation7] sm:$0xff] }
  0x14   :  { %140 = vmatpush.msra.mxu1 %v118_v2  ;;  %191 = vmatpush.msra.mxu2 %v118_v2  ;;  %v113_v11 = vld [vmem:[#allocation7 + $0x8] sm:$0xff]  ;;  %v208_v13 = vld [vmem:[%s378_s2] ss:$0 sm:$0xff] }
  0x15   :  { %103 = vmatpush.bf16.msra.mxu0 %v188_v3  ;;  %v209_v20 = vld [vmem:[%s380_s4] ss:$0 sm:$0xff] }
  0x16   :  { %141 = vmatpush.msra.mxu1 %v117_v6  ;;  %192 = vmatpush.msra.mxu2 %v117_v6 }
  0x18   :  { %142 = vmatpush.msra.mxu1 %v116_v8  ;;  %185 = vmatmul.msk.bf16.vlgmr.msra.gmra.mxu0 %vm92_vm0, %v71_v7 }
  0x19   :  { %193 = vmatpush.msra.mxu2 %v116_v8 }
  0x1a   :  { %143 = vmatpush.msra.mxu1 %v115_v9 }
  0x1b   :  { %194 = vmatpush.msra.mxu2 %v115_v9 }
  0x1c   :  { %144 = vmatpush.msra.mxu1 %v114_v10 }
  0x1d   :  { %195 = vmatpush.msra.mxu2 %v114_v10 }
  0x1e   :  { %145 = vmatpush.msra.mxu1 %v113_v11 }
  0x1f   :  { %196 = vmatpush.msra.mxu2 %v113_v11 }
  0x20   :  { %146 = vmatpush.msra.mxu1 %v112_v12 }
  0x21   :  { %197 = vmatpush.msra.mxu2 %v112_v12 }
  0x95   :  { %v105_v14 = vpop.f32.mrf.mxu0 }
  0x96   :  { %v106_v15 = vadd.f32 %v208_v13, %v105_v14 }
  0x98   :  { %v110_v16 = vmax.f32 %v106_v15, 0.0 }
  0x9a   :  { %186 = vmatmul.msk.f32.vlgmr.msra.gmra.mxu1 %vm124_vm1, %v110_v16 }
  0x9d   :  { %v107_v17 = vpop.f32.mrf.mxu0 }
  0x9e   :  { %v108_v18 = vadd.f32 %v208_v13, %v107_v17 }
  0xa0   :  { %v111_v19 = vmax.f32 %v108_v18, 0.0 }
  0xa2   :  { %187 = vmatmul.msk.f32.vlgmr.msra.gmra.mxu2 %vm124_vm1, %v111_v19 }
 0x117   :  { %v148_v21 = vpop.f32.mrf.mxu1 }
 0x118   :  { %v149_v22 = vadd.f32 %v209_v20, %v148_v21 }
 0x11a   :  { %155 = vst.msk [vmem:[#allocation8] sm:$0xff] %vm154_vm2, %v149_v22 }
 0x125   :  { %v151_v23 = vpop.f32.mrf.mxu2 }
 0x126   :  { %v152_v24 = vadd.f32 %v209_v20, %v151_v23 }
 0x128   :  { %156 = vst.msk [vmem:[#allocation8 + $0x8] sm:$0xff] %vm154_vm2, %v152_v24 }
 0x129   :  { %160 = vsyncadd [#allocation4], 224  ;;  %s163_s16 = sshll.u32 %s381_s5, 4  ;;  %s321_s17 = smov [#allocation8]   ;;  %s164_s16 = int_to_ptr.hbm [resolvable:$true] %s163_s16 }
 0x12a   :  { %s161_s18 = sshll.u32 %s321_s17, 4  ;;  %s162_s18 = int_to_ptr.vmem [resolvable:$true] %s161_s18 }
 0x12b   :  { %169 = dma.vmem_to_hbm [thread:$0]  %s162_s18, 32, %s164_s16, [#allocation4], %s316_s30, %s316_s30, %s317_s6  }
 0x12c   :  { %310 = dma.done.wait [#allocation4], 256  }
 0x12d   :  { %311 = vsyncadd [#allocation4], 4294967040 }
 0x12e   :  { %174 = vsyncpa [#allocation3], 1 }
 0x12f   :  { %175 = vsyncpa [#allocation6], 1 }
 0x130   :  { %176 = vsyncpa [#allocation4], 1 }

</bundles_post_ra>
